<compile_context>
chip_gen: v6e
topology: v6e:2x2x1
jax: 0.10.0
libtpu: 0.0.40
codegen_flags: <defaults>
</compile_context>

<pallas_src>
import jax
import jax.numpy as jnp
from jax.experimental import pallas as pl
from jax.experimental.pallas import tpu as pltpu


_LANE = 128            # TPU lane width; batch lives on the lane axis
_TILE_B_MAX = 1024     # max batch rows per grid step (keeps vreg pressure sane)


def _round_up(x, m):
    return ((x + m - 1) // m) * m


def _choose_tiling(batch):
    """Pick (tile_b, b_pad): lane-aligned tiles, low padding waste, and >=2
    grid steps whenever there is enough work (v7x dual TensorCore)."""
    b_min = _round_up(batch, _LANE)
    candidates = []
    t = _LANE
    while t <= _TILE_B_MAX:
        candidates.append(t)
        t *= 2
    best = None
    for t in candidates:
        b_pad = _round_up(batch, t)
        steps = b_pad // t
        # primary: use both v7x TensorCores whenever there are >=2 lane-chunks
        single_core_penalty = 0 if (steps >= 2 or b_min <= _LANE) else 1
        # secondary: padded rows processed + ~128-row-equivalent per-step overhead
        cost = b_pad + _LANE * steps
        key = (single_core_penalty, cost, -t)
        if best is None or key < best[0]:
            best = (key, t, b_pad)
    return best[1], best[2]


def phasic_policy_kernel(
    state_ref, action_ref,                       # (state_dim|action_dim, TILE_B)
    w1s_ref, w1a_ref, b1_ref,                    # first Linear, split by input
    w2_ref, b2_ref,                              # second shared Linear
    wp_ref, bp_ref,                              # policy head Linear
    wv1_ref, bv1_ref, wv2_ref, bv2_ref, wv3_ref, bv3_ref,   # value head
    policy_ref, value_ref,                       # (action_dim, TILE_B), (1, TILE_B)
):
    # clamp: state to [-5, 5], action to [-1, 1] (plain scalar clips)
    s = jnp.clip(state_ref[...], -5.0, 5.0)
    a = jnp.clip(action_ref[...], -1.0, 1.0)

    # shared trunk: Linear -> ReLU -> Dropout(id) -> Linear -> ReLU -> Dropout(id)
    h = jnp.dot(w1s_ref[...], s, preferred_element_type=jnp.float32)
    if a.shape[0] == 1:
        # action_dim == 1: K=1 contraction as a VPU outer product
        h = h + w1a_ref[...] * a
    else:
        h = h + jnp.dot(w1a_ref[...], a, preferred_element_type=jnp.float32)
    h = jnp.maximum(h + b1_ref[...], 0.0)
    h = jnp.dot(w2_ref[...], h, preferred_element_type=jnp.float32) + b2_ref[...]
    h = jnp.maximum(h, 0.0)

    # policy head: Linear(hidden -> action_dim) + tanh; output row is lane-dense
    policy_ref[...] = jnp.tanh(
        jnp.dot(wp_ref[...], h, preferred_element_type=jnp.float32) + bp_ref[...]
    )

    # value head: Linear -> LeakyReLU -> Linear -> LeakyReLU -> Linear
    v = jnp.dot(wv1_ref[...], h, preferred_element_type=jnp.float32) + bv1_ref[...]
    v = jnp.where(v > 0, v, 0.01 * v)
    v = jnp.dot(wv2_ref[...], v, preferred_element_type=jnp.float32) + bv2_ref[...]
    v = jnp.where(v > 0, v, 0.01 * v)
    value_ref[...] = (
        jnp.dot(wv3_ref[...], v, preferred_element_type=jnp.float32) + bv3_ref[...]
    )


def _xavier_uniform(key, fan_in, fan_out, gain=0.01):
    # matches torch.nn.init.xavier_uniform_ with gain=0.01; stored as (in, out)
    bound = gain * jnp.sqrt(6.0 / (fan_in + fan_out))
    return jax.random.uniform(
        key, (fan_in, fan_out), dtype=jnp.float32, minval=-bound, maxval=bound
    )


def init_params(key, state_dim=3, action_dim=1, hidden_dim=64):
    in_dim = state_dim + action_dim
    ks = jax.random.split(key, 6)
    return {
        "w1": _xavier_uniform(ks[0], in_dim, hidden_dim),
        "b1": jnp.zeros((1, hidden_dim), jnp.float32),
        "w2": _xavier_uniform(ks[1], hidden_dim, hidden_dim),
        "b2": jnp.zeros((1, hidden_dim), jnp.float32),
        "wp": _xavier_uniform(ks[2], hidden_dim, action_dim),
        "bp": jnp.zeros((1, action_dim), jnp.float32),
        "wv1": _xavier_uniform(ks[3], hidden_dim, hidden_dim),
        "bv1": jnp.zeros((1, hidden_dim), jnp.float32),
        "wv2": _xavier_uniform(ks[4], hidden_dim, hidden_dim // 2),
        "bv2": jnp.zeros((1, hidden_dim // 2), jnp.float32),
        "wv3": _xavier_uniform(ks[5], hidden_dim // 2, 1),
        "bv3": jnp.zeros((1, 1), jnp.float32),
    }


def _lane_major(x, b_pad):
    """(B, feat) -> (feat, b_pad): batch on the lane axis, zero-padded tail."""
    xt = jnp.transpose(x)
    pad = b_pad - xt.shape[1]
    if pad:
        xt = jnp.pad(xt, ((0, 0), (0, pad)))
    return xt


@jax.jit
def phasic_policy_forward(state, action, params):
    # TODO(synk): PyTorch raises ValueError on NaN inputs; no clean in-kernel
    # equivalent of raising an exception - NaN check omitted.
    state = state.astype(jnp.float32)
    action = action.astype(jnp.float32)

    B, state_dim = state.shape
    action_dim = action.shape[1]

    tile_b, b_pad = _choose_tiling(B)
    grid = (b_pad // tile_b,)

    # activations, batch-on-lanes
    state_t = _lane_major(state, b_pad)      # (state_dim, b_pad)
    action_t = _lane_major(action, b_pad)    # (action_dim, b_pad)

    # weights pre-transposed for the batch-on-lanes layout: h_t = W^T @ x_t
    w1t = params["w1"].T                     # (hidden, state_dim + action_dim)
    weights = (
        w1t[:, :state_dim],                  # (hidden, state_dim)
        w1t[:, state_dim:],                  # (hidden, action_dim)
        params["b1"].T,                      # (hidden, 1)
        params["w2"].T, params["b2"].T,
        params["wp"].T, params["bp"].T,      # (action_dim, hidden), (action_dim, 1)
        params["wv1"].T, params["bv1"].T,
        params["wv2"].T, params["bv2"].T,
        params["wv3"].T, params["bv3"].T,    # (1, hidden//2), (1, 1)
    )

    def resident(w):
        # full-array block, constant index_map -> stays in VMEM across the grid
        return pl.BlockSpec(w.shape, lambda i: (0, 0))

    policy_t, value_t = pl.pallas_call(
        phasic_policy_kernel,
        out_shape=(
            jax.ShapeDtypeStruct((action_dim, b_pad), jnp.float32),
            jax.ShapeDtypeStruct((1, b_pad), jnp.float32),
        ),
        grid=grid,
        in_specs=[
            pl.BlockSpec((state_dim, tile_b), lambda i: (0, i)),
            pl.BlockSpec((action_dim, tile_b), lambda i: (0, i)),
        ] + [resident(w) for w in weights],
        out_specs=(
            pl.BlockSpec((action_dim, tile_b), lambda i: (0, i)),
            pl.BlockSpec((1, tile_b), lambda i: (0, i)),
        ),
        compiler_params=pltpu.CompilerParams(
            dimension_semantics=("parallel",),
            vmem_limit_bytes=32 * 1024 * 1024,
        ),
    )(state_t, action_t, *weights)

    policy_out = policy_t[:, :B].T           # (B, action_dim)
    value_out = value_t[:, :B].T             # (B, 1)
    return policy_out, value_out


def _reference_forward(state, action, params):
    # pure-JAX reference for sanity checking
    x = jnp.concatenate(
        [jnp.clip(state.astype(jnp.float32), -5, 5),
         jnp.clip(action.astype(jnp.float32), -1, 1)], axis=-1)
    h = jnp.maximum(x @ params["w1"] + params["b1"], 0)
    h = jnp.maximum(h @ params["w2"] + params["b2"], 0)
    p = jnp.tanh(h @ params["wp"] + params["bp"])
    v = h @ params["wv1"] + params["bv1"]
    v = jnp.where(v > 0, v, 0.01 * v)
    v = v @ params["wv2"] + params["bv2"]
    v = jnp.where(v > 0, v, 0.01 * v)
    v = v @ params["wv3"] + params["bv3"]
    return p, v


if __name__ == "__main__":
    key = jax.random.PRNGKey(0)
    k_param, k_state, k_action = jax.random.split(key, 3)

    STATE_DIM, ACTION_DIM, HIDDEN_DIM, BATCH = 3, 1, 64, 8

    params = init_params(k_param, STATE_DIM, ACTION_DIM, HIDDEN_DIM)
    state = jax.random.normal(k_state, (BATCH, STATE_DIM), jnp.float32) * 3.0
    action = jax.random.normal(k_action, (BATCH, ACTION_DIM), jnp.float32)

    policy_out, value_out = phasic_policy_forward(state, action, params)
    jax.block_until_ready((policy_out, value_out))

    ref_p, ref_v = _reference_forward(state, action, params)
    assert policy_out.shape == (BATCH, ACTION_DIM)
    assert value_out.shape == (BATCH, 1)
    assert jnp.allclose(policy_out, ref_p, atol=1e-5)
    assert jnp.allclose(value_out, ref_v, atol=1e-5)

    # multi-step grid + ragged tail (exercises lane padding, resident weights,
    # and the >=2-step / dual-TensorCore tiling path)
    B2 = 300
    k_s2, k_a2 = jax.random.split(jax.random.PRNGKey(1))
    state2 = jax.random.normal(k_s2, (B2, STATE_DIM), jnp.float32) * 3.0
    action2 = jax.random.normal(k_a2, (B2, ACTION_DIM), jnp.float32)
    p2, v2 = phasic_policy_forward(state2, action2, params)
    jax.block_until_ready((p2, v2))
    rp2, rv2 = _reference_forward(state2, action2, params)
    assert p2.shape == (B2, ACTION_DIM) and v2.shape == (B2, 1)
    assert jnp.allclose(p2, rp2, atol=1e-5)
    assert jnp.allclose(v2, rv2, atol=1e-5)

    print("KERNEL_OK")
</pallas_src>

<mosaic_0001>
module attributes {stable_mosaic.version = 11 : i64} {
  func.func @phasic_policy_kernel(%arg0: i32, %arg1: memref<3x128xf32, #tpu.memory_space<vmem>>, %arg2: memref<1x128xf32, #tpu.memory_space<vmem>>, %arg3: memref<64x3xf32, #tpu.memory_space<vmem>>, %arg4: memref<64x1xf32, #tpu.memory_space<vmem>>, %arg5: memref<64x1xf32, #tpu.memory_space<vmem>>, %arg6: memref<64x64xf32, #tpu.memory_space<vmem>>, %arg7: memref<64x1xf32, #tpu.memory_space<vmem>>, %arg8: memref<1x64xf32, #tpu.memory_space<vmem>>, %arg9: memref<1x1xf32, #tpu.memory_space<vmem>>, %arg10: memref<64x64xf32, #tpu.memory_space<vmem>>, %arg11: memref<64x1xf32, #tpu.memory_space<vmem>>, %arg12: memref<32x64xf32, #tpu.memory_space<vmem>>, %arg13: memref<32x1xf32, #tpu.memory_space<vmem>>, %arg14: memref<1x32xf32, #tpu.memory_space<vmem>>, %arg15: memref<1x1xf32, #tpu.memory_space<vmem>>, %arg16: memref<1x128xf32, #tpu.memory_space<vmem>>, %arg17: memref<1x128xf32, #tpu.memory_space<vmem>>) attributes {dimension_semantics = [#tpu.dimension_semantics<parallel>], iteration_bounds = array<i64: 1>, scalar_prefetch = 0 : i64, scratch_operands = 0 : i64, tpu.core_type = #tpu.core_type<tc>, window_params = [{transform_indices = @transform_0, window_bounds = array<i64: 3, 128>}, {transform_indices = @transform_1, window_bounds = array<i64: 1, 128>}, {pipeline_mode = #tpu.pipeline_mode<synchronous>, transform_indices = @transform_2, window_bounds = array<i64: 64, 3>}, {pipeline_mode = #tpu.pipeline_mode<synchronous>, transform_indices = @transform_3, window_bounds = array<i64: 64, 1>}, {pipeline_mode = #tpu.pipeline_mode<synchronous>, transform_indices = @transform_4, window_bounds = array<i64: 64, 1>}, {pipeline_mode = #tpu.pipeline_mode<synchronous>, transform_indices = @transform_5, window_bounds = array<i64: 64, 64>}, {pipeline_mode = #tpu.pipeline_mode<synchronous>, transform_indices = @transform_6, window_bounds = array<i64: 64, 1>}, {pipeline_mode = #tpu.pipeline_mode<synchronous>, transform_indices = @transform_7, window_bounds = array<i64: 1, 64>}, {pipeline_mode = #tpu.pipeline_mode<synchronous>, transform_indices = @transform_8, window_bounds = array<i64: 1, 1>}, {pipeline_mode = #tpu.pipeline_mode<synchronous>, transform_indices = @transform_9, window_bounds = array<i64: 64, 64>}, {pipeline_mode = #tpu.pipeline_mode<synchronous>, transform_indices = @transform_10, window_bounds = array<i64: 64, 1>}, {pipeline_mode = #tpu.pipeline_mode<synchronous>, transform_indices = @transform_11, window_bounds = array<i64: 32, 64>}, {pipeline_mode = #tpu.pipeline_mode<synchronous>, transform_indices = @transform_12, window_bounds = array<i64: 32, 1>}, {pipeline_mode = #tpu.pipeline_mode<synchronous>, transform_indices = @transform_13, window_bounds = array<i64: 1, 32>}, {pipeline_mode = #tpu.pipeline_mode<synchronous>, transform_indices = @transform_14, window_bounds = array<i64: 1, 1>}, {transform_indices = @transform_15, window_bounds = array<i64: 1, 128>}, {transform_indices = @transform_16, window_bounds = array<i64: 1, 128>}]} {
    %c0 = arith.constant 0 : index
    %c0_0 = arith.constant 0 : index
    %0 = vector.load %arg1[%c0, %c0_0] : memref<3x128xf32, #tpu.memory_space<vmem>>, vector<3x128xf32>
    %cst = arith.constant -5.000000e+00 : f32
    %cst_1 = arith.constant 5.000000e+00 : f32
    %1 = vector.broadcast %cst : f32 to vector<3x128xf32>
    %2 = arith.maximumf %1, %0 : vector<3x128xf32>
    %3 = vector.broadcast %cst_1 : f32 to vector<3x128xf32>
    %4 = arith.minimumf %3, %2 : vector<3x128xf32>
    %c0_2 = arith.constant 0 : index
    %c0_3 = arith.constant 0 : index
    %5 = vector.load %arg2[%c0_2, %c0_3] : memref<1x128xf32, #tpu.memory_space<vmem>>, vector<1x128xf32>
    %cst_4 = arith.constant -1.000000e+00 : f32
    %cst_5 = arith.constant 1.000000e+00 : f32
    %6 = vector.broadcast %cst_4 : f32 to vector<1x128xf32>
    %7 = arith.maximumf %6, %5 : vector<1x128xf32>
    %8 = vector.broadcast %cst_5 : f32 to vector<1x128xf32>
    %9 = arith.minimumf %8, %7 : vector<1x128xf32>
    %c0_6 = arith.constant 0 : index
    %c0_7 = arith.constant 0 : index
    %10 = vector.load %arg3[%c0_6, %c0_7] : memref<64x3xf32, #tpu.memory_space<vmem>>, vector<64x3xf32>
    %cst_8 = arith.constant dense<0.000000e+00> : vector<64x128xf32>
    %11 = tpu.matmul %10, %4, %cst_8 {dimension_numbers = #tpu.dot_dimension_numbers<[1], [0], [0], [1], [0, 0, 1, 1], [], []>} : vector<64x3xf32>, vector<3x128xf32>, vector<64x128xf32> -> vector<64x128xf32>
    %c0_9 = arith.constant 0 : index
    %c0_10 = arith.constant 0 : index
    %12 = vector.load %arg4[%c0_9, %c0_10] : memref<64x1xf32, #tpu.memory_space<vmem>>, vector<64x1xf32>
    %13 = vector.broadcast %12 : vector<64x1xf32> to vector<64x128xf32>
    %14 = vector.broadcast %9 : vector<1x128xf32> to vector<64x128xf32>
    %15 = arith.mulf %13, %14 : vector<64x128xf32>
    %16 = arith.addf %11, %15 : vector<64x128xf32>
    %c0_11 = arith.constant 0 : index
    %c0_12 = arith.constant 0 : index
    %17 = vector.load %arg5[%c0_11, %c0_12] : memref<64x1xf32, #tpu.memory_space<vmem>>, vector<64x1xf32>
    %18 = vector.broadcast %17 : vector<64x1xf32> to vector<64x128xf32>
    %19 = arith.addf %16, %18 : vector<64x128xf32>
    %cst_13 = arith.constant 0.000000e+00 : f32
    %20 = vector.broadcast %cst_13 : f32 to vector<64x128xf32>
    %21 = arith.maximumf %19, %20 : vector<64x128xf32>
    %c0_14 = arith.constant 0 : index
    %c0_15 = arith.constant 0 : index
    %22 = vector.load %arg6[%c0_14, %c0_15] : memref<64x64xf32, #tpu.memory_space<vmem>>, vector<64x64xf32>
    %cst_16 = arith.constant dense<0.000000e+00> : vector<64x128xf32>
    %23 = tpu.matmul %22, %21, %cst_16 {dimension_numbers = #tpu.dot_dimension_numbers<[1], [0], [0], [1], [0, 0, 1, 1], [], []>} : vector<64x64xf32>, vector<64x128xf32>, vector<64x128xf32> -> vector<64x128xf32>
    %c0_17 = arith.constant 0 : index
    %c0_18 = arith.constant 0 : index
    %24 = vector.load %arg7[%c0_17, %c0_18] : memref<64x1xf32, #tpu.memory_space<vmem>>, vector<64x1xf32>
    %25 = vector.broadcast %24 : vector<64x1xf32> to vector<64x128xf32>
    %26 = arith.addf %23, %25 : vector<64x128xf32>
    %cst_19 = arith.constant 0.000000e+00 : f32
    %27 = vector.broadcast %cst_19 : f32 to vector<64x128xf32>
    %28 = arith.maximumf %26, %27 : vector<64x128xf32>
    %c0_20 = arith.constant 0 : index
    %c0_21 = arith.constant 0 : index
    %29 = vector.load %arg8[%c0_20, %c0_21] : memref<1x64xf32, #tpu.memory_space<vmem>>, vector<1x64xf32>
    %cst_22 = arith.constant dense<0.000000e+00> : vector<1x128xf32>
    %30 = tpu.matmul %29, %28, %cst_22 {dimension_numbers = #tpu.dot_dimension_numbers<[1], [0], [0], [1], [0, 0, 1, 1], [], []>} : vector<1x64xf32>, vector<64x128xf32>, vector<1x128xf32> -> vector<1x128xf32>
    %c0_23 = arith.constant 0 : index
    %c0_24 = arith.constant 0 : index
    %31 = vector.load %arg9[%c0_23, %c0_24] : memref<1x1xf32, #tpu.memory_space<vmem>>, vector<1x1xf32>
    %32 = vector.broadcast %31 : vector<1x1xf32> to vector<1x128xf32>
    %33 = arith.addf %30, %32 : vector<1x128xf32>
    %34 = math.tanh %33 : vector<1x128xf32>
    %c0_25 = arith.constant 0 : index
    %c0_26 = arith.constant 0 : index
    %35 = vector.load %arg16[%c0_25, %c0_26] : memref<1x128xf32, #tpu.memory_space<vmem>>, vector<1x128xf32>
    tpu.vector_store %arg16[%c0_25, %c0_26], %34 {strides = array<i32>} : memref<1x128xf32, #tpu.memory_space<vmem>>, vector<1x128xf32>,
    %c0_27 = arith.constant 0 : index
    %c0_28 = arith.constant 0 : index
    %36 = vector.load %arg10[%c0_27, %c0_28] : memref<64x64xf32, #tpu.memory_space<vmem>>, vector<64x64xf32>
    %cst_29 = arith.constant dense<0.000000e+00> : vector<64x128xf32>
    %37 = tpu.matmul %36, %28, %cst_29 {dimension_numbers = #tpu.dot_dimension_numbers<[1], [0], [0], [1], [0, 0, 1, 1], [], []>} : vector<64x64xf32>, vector<64x128xf32>, vector<64x128xf32> -> vector<64x128xf32>
    %c0_30 = arith.constant 0 : index
    %c0_31 = arith.constant 0 : index
    %38 = vector.load %arg11[%c0_30, %c0_31] : memref<64x1xf32, #tpu.memory_space<vmem>>, vector<64x1xf32>
    %39 = vector.broadcast %38 : vector<64x1xf32> to vector<64x128xf32>
    %40 = arith.addf %37, %39 : vector<64x128xf32>
    %cst_32 = arith.constant 0.000000e+00 : f32
    %41 = vector.broadcast %cst_32 : f32 to vector<64x128xf32>
    %42 = arith.cmpf ogt, %40, %41 : vector<64x128xf32>
    %cst_33 = arith.constant 0.00999999977 : f32
    %43 = vector.broadcast %cst_33 : f32 to vector<64x128xf32>
    %44 = arith.mulf %43, %40 : vector<64x128xf32>
    %45 = arith.select %42, %40, %44 : vector<64x128xi1>, vector<64x128xf32>
    %c0_34 = arith.constant 0 : index
    %c0_35 = arith.constant 0 : index
    %46 = vector.load %arg12[%c0_34, %c0_35] : memref<32x64xf32, #tpu.memory_space<vmem>>, vector<32x64xf32>
    %cst_36 = arith.constant dense<0.000000e+00> : vector<32x128xf32>
    %47 = tpu.matmul %46, %45, %cst_36 {dimension_numbers = #tpu.dot_dimension_numbers<[1], [0], [0], [1], [0, 0, 1, 1], [], []>} : vector<32x64xf32>, vector<64x128xf32>, vector<32x128xf32> -> vector<32x128xf32>
    %c0_37 = arith.constant 0 : index
    %c0_38 = arith.constant 0 : index
    %48 = vector.load %arg13[%c0_37, %c0_38] : memref<32x1xf32, #tpu.memory_space<vmem>>, vector<32x1xf32>
    %49 = vector.broadcast %48 : vector<32x1xf32> to vector<32x128xf32>
    %50 = arith.addf %47, %49 : vector<32x128xf32>
    %cst_39 = arith.constant 0.000000e+00 : f32
    %51 = vector.broadcast %cst_39 : f32 to vector<32x128xf32>
    %52 = arith.cmpf ogt, %50, %51 : vector<32x128xf32>
    %cst_40 = arith.constant 0.00999999977 : f32
    %53 = vector.broadcast %cst_40 : f32 to vector<32x128xf32>
    %54 = arith.mulf %53, %50 : vector<32x128xf32>
    %55 = arith.select %52, %50, %54 : vector<32x128xi1>, vector<32x128xf32>
    %c0_41 = arith.constant 0 : index
    %c0_42 = arith.constant 0 : index
    %56 = vector.load %arg14[%c0_41, %c0_42] : memref<1x32xf32, #tpu.memory_space<vmem>>, vector<1x32xf32>
    %cst_43 = arith.constant dense<0.000000e+00> : vector<1x128xf32>
    %57 = tpu.matmul %56, %55, %cst_43 {dimension_numbers = #tpu.dot_dimension_numbers<[1], [0], [0], [1], [0, 0, 1, 1], [], []>} : vector<1x32xf32>, vector<32x128xf32>, vector<1x128xf32> -> vector<1x128xf32>
    %c0_44 = arith.constant 0 : index
    %c0_45 = arith.constant 0 : index
    %58 = vector.load %arg15[%c0_44, %c0_45] : memref<1x1xf32, #tpu.memory_space<vmem>>, vector<1x1xf32>
    %59 = vector.broadcast %58 : vector<1x1xf32> to vector<1x128xf32>
    %60 = arith.addf %57, %59 : vector<1x128xf32>
    %c0_46 = arith.constant 0 : index
    %c0_47 = arith.constant 0 : index
    %61 = vector.load %arg17[%c0_46, %c0_47] : memref<1x128xf32, #tpu.memory_space<vmem>>, vector<1x128xf32>
    tpu.vector_store %arg17[%c0_46, %c0_47], %60 {strides = array<i32>} : memref<1x128xf32, #tpu.memory_space<vmem>>, vector<1x128xf32>,
    return
  }
  func.func @transform_0(%arg0: i32) -> (i32, i32) {
    %c0_i32 = arith.constant 0 : i32
    %c0_i32_0 = arith.constant 0 : i32
    return %c0_i32, %arg0 : i32, i32
  }
  func.func @transform_1(%arg0: i32) -> (i32, i32) {
    %c0_i32 = arith.constant 0 : i32
    %c0_i32_0 = arith.constant 0 : i32
    return %c0_i32, %arg0 : i32, i32
  }
  func.func @transform_2(%arg0: i32) -> (i32, i32) {
    %c0_i32 = arith.constant 0 : i32
    %c0_i32_0 = arith.constant 0 : i32
    %c0_i32_1 = arith.constant 0 : i32
    return %c0_i32, %c0_i32_0 : i32, i32
  }
  func.func @transform_3(%arg0: i32) -> (i32, i32) {
    %c0_i32 = arith.constant 0 : i32
    %c0_i32_0 = arith.constant 0 : i32
    %c0_i32_1 = arith.constant 0 : i32
    return %c0_i32, %c0_i32_0 : i32, i32
  }
  func.func @transform_4(%arg0: i32) -> (i32, i32) {
    %c0_i32 = arith.constant 0 : i32
    %c0_i32_0 = arith.constant 0 : i32
    %c0_i32_1 = arith.constant 0 : i32
    return %c0_i32, %c0_i32_0 : i32, i32
  }
  func.func @transform_5(%arg0: i32) -> (i32, i32) {
    %c0_i32 = arith.constant 0 : i32
    %c0_i32_0 = arith.constant 0 : i32
    %c0_i32_1 = arith.constant 0 : i32
    return %c0_i32, %c0_i32_0 : i32, i32
  }
  func.func @transform_6(%arg0: i32) -> (i32, i32) {
    %c0_i32 = arith.constant 0 : i32
    %c0_i32_0 = arith.constant 0 : i32
    %c0_i32_1 = arith.constant 0 : i32
    return %c0_i32, %c0_i32_0 : i32, i32
  }
  func.func @transform_7(%arg0: i32) -> (i32, i32) {
    %c0_i32 = arith.constant 0 : i32
    %c0_i32_0 = arith.constant 0 : i32
    %c0_i32_1 = arith.constant 0 : i32
    return %c0_i32, %c0_i32_0 : i32, i32
  }
  func.func @transform_8(%arg0: i32) -> (i32, i32) {
    %c0_i32 = arith.constant 0 : i32
    %c0_i32_0 = arith.constant 0 : i32
    %c0_i32_1 = arith.constant 0 : i32
    return %c0_i32, %c0_i32_0 : i32, i32
  }
  func.func @transform_9(%arg0: i32) -> (i32, i32) {
    %c0_i32 = arith.constant 0 : i32
    %c0_i32_0 = arith.constant 0 : i32
    %c0_i32_1 = arith.constant 0 : i32
    return %c0_i32, %c0_i32_0 : i32, i32
  }
  func.func @transform_10(%arg0: i32) -> (i32, i32) {
    %c0_i32 = arith.constant 0 : i32
    %c0_i32_0 = arith.constant 0 : i32
    %c0_i32_1 = arith.constant 0 : i32
    return %c0_i32, %c0_i32_0 : i32, i32
  }
  func.func @transform_11(%arg0: i32) -> (i32, i32) {
    %c0_i32 = arith.constant 0 : i32
    %c0_i32_0 = arith.constant 0 : i32
    %c0_i32_1 = arith.constant 0 : i32
    return %c0_i32, %c0_i32_0 : i32, i32
  }
  func.func @transform_12(%arg0: i32) -> (i32, i32) {
    %c0_i32 = arith.constant 0 : i32
    %c0_i32_0 = arith.constant 0 : i32
    %c0_i32_1 = arith.constant 0 : i32
    return %c0_i32, %c0_i32_0 : i32, i32
  }
  func.func @transform_13(%arg0: i32) -> (i32, i32) {
    %c0_i32 = arith.constant 0 : i32
    %c0_i32_0 = arith.constant 0 : i32
    %c0_i32_1 = arith.constant 0 : i32
    return %c0_i32, %c0_i32_0 : i32, i32
  }
  func.func @transform_14(%arg0: i32) -> (i32, i32) {
    %c0_i32 = arith.constant 0 : i32
    %c0_i32_0 = arith.constant 0 : i32
    %c0_i32_1 = arith.constant 0 : i32
    return %c0_i32, %c0_i32_0 : i32, i32
  }
  func.func @transform_15(%arg0: i32) -> (i32, i32) {
    %c0_i32 = arith.constant 0 : i32
    %c0_i32_0 = arith.constant 0 : i32
    return %c0_i32, %arg0 : i32, i32
  }
  func.func @transform_16(%arg0: i32) -> (i32, i32) {
    %c0_i32 = arith.constant 0 : i32
    %c0_i32_0 = arith.constant 0 : i32
    return %c0_i32, %arg0 : i32, i32
  }
}

</mosaic_0001>

<bundles_post_ra>
// kernel: phasic_policy_forward.1
= control target key start
LH: loop header
LB: loop body
LE: loop exit
PB: predicated region body
PF: predicated region fallthrough
CT: control target
= control target key end

     0   :  { %vm132_vm0 = vcmask 23552   ;;  %v1279_v0 = vmov 0   ;;  %vm157_vm1 = vcmask 1042432   ;;  %vm386_vm2 = vcmask 523264   ;;  %s1641_s3 = inlined_call_operand.vmem [shape: f32[64,1], index: 3, kind: input, shape index: {}]   ;;  %s1642_s0 = inlined_call_operand.vmem [shape: f32[3,128], index: 0, kind: input, shape index: {}]   ;;  %s1643_s2 = inlined_call_operand.vmem [shape: f32[64,3], index: 2, kind: input, shape index: {}]   ;;  %s1644_s8 = inlined_call_operand.<no memory space> [shape: f32[1,1], index: 8, kind: input, shape index: {}]   ;;  %s1645_s14 = inlined_call_operand.<no memory space> [shape: f32[1,1], index: 14, kind: input, shape index: {}]   ;;  %s1646_s4 = inlined_call_operand.vmem [shape: f32[64,1], index: 4, kind: input, shape index: {}]   ;;  %s1647_s6 = inlined_call_operand.vmem [shape: f32[64,1], index: 6, kind: input, shape index: {}]   ;;  %s1648_s10 = inlined_call_operand.vmem [shape: f32[64,1], index: 10, kind: input, shape index: {}]   ;;  %s1649_s12 = inlined_call_operand.vmem [shape: f32[32,1], index: 12, kind: input, shape index: {}]   ;;  %s1650_s5 = inlined_call_operand.vmem [shape: f32[64,64], index: 5, kind: input, shape index: {}]   ;;  %s1651_s1 = inlined_call_operand.vmem [shape: f32[1,128], index: 1, kind: input, shape index: {}]   ;;  %s1652_s9 = inlined_call_operand.vmem [shape: f32[64,64], index: 9, kind: input, shape index: {}]   ;;  %s1653_s7 = inlined_call_operand.vmem [shape: f32[1,64], index: 7, kind: input, shape index: {}]   ;;  %s1654_s11 = inlined_call_operand.vmem [shape: f32[32,64], index: 11, kind: input, shape index: {}]   ;;  %s1655_s15 = inlined_call_operand.vmem [shape: f32[1,128], index: 15, kind: output, shape index: {0}]   ;;  %s1656_s13 = inlined_call_operand.vmem [shape: f32[1,32], index: 13, kind: input, shape index: {}]   ;;  %s1657_s16 = inlined_call_operand.vmem [shape: f32[1,128], index: 16, kind: output, shape index: {1}]  }
   0x1   :  { %1659 = sst [smem:[#allocation4_spill]] %s1641_s3  ;;  %1275 = vset.pattern.permute.xlu0 %v1279_v0  ;;  %1276 = vset.pattern.permute.xlu1 %v1279_v0  ;;  %v56_v3 = vld [vmem:[%s1642_s0] sm:$0x7]  ;;  %v22_v4 = vstv %s1644_s8  ;;  %v24_v7 = vstv %s1645_s14  ;;  %v63_v9 = vld [vmem:[%s1643_s2 + $0x8] sm:$0xff]  ;;  %v119_v57 = vlaneseq  ;;  %vm1281_vm3 = vmmov 0  }
   0x2   :  { %s1660_s23 = sld [smem:[#allocation4_spill]]  ;;  %v1050_v5 = vclamps-f32 %v56_v3, 5.0  ;;  %v62_v6 = vld [vmem:[%s1643_s2] sm:$0xff]  ;;  %23 = vst [vmem:[#allocation2] sm:$0x1] %v22_v4  ;;  %v273_v10 = vld [vmem:[%s1646_s4 + $0x38] sm:$0xff] }
   0x3   :  { %1152 = vmatprep.mubr.msk.f32.mxu0 %vm132_vm0, %v62_v6  ;;  %25 = vst [vmem:[#allocation3] sm:$0x1] %v24_v7  ;;  %v64_v11 = vld [vmem:[%s1643_s2 + $0x10] sm:$0xff]  ;;  %v65_v13 = vld [vmem:[%s1643_s2 + $0x18] sm:$0xff]  ;;  %v66_v15 = vld [vmem:[%s1643_s2 + $0x20] sm:$0xff]  ;;  %v120_v59 = vshrl.u32 %v119_v57, 7 }
   0x4   :  { %1150 = vmatprep.subr.msk.mxu0 %vm157_vm1, %v1050_v5  ;;  %v272_v14 = vld [vmem:[%s1646_s4 + $0x30] sm:$0xff]  ;;  %v67_v17 = vld [vmem:[%s1643_s2 + $0x28] sm:$0xff]  ;;  %v69_v21 = vld [vmem:[%s1643_s2 + $0x38] sm:$0xff]  ;;  %v1280_v57 = vmov 0.0  }
   0x5   :  { %1151 = vmatpush3.msk.msra.mxu0 %vm157_vm1, %v1050_v5  ;;  %v271_v18 = vld [vmem:[%s1646_s4 + $0x28] sm:$0xff]  ;;  %v68_v19 = vld [vmem:[%s1643_s2 + $0x30] sm:$0xff]  ;;  %v270_v22 = vld [vmem:[%s1646_s4 + $0x20] sm:$0xff] }
   0x6   :  { %1153 = vmatmul.mubr.msk.f32.vlgmr.msra.gmra.mxu0 %vm132_vm0, %v63_v9  ;;  %v269_v24 = vld [vmem:[%s1646_s4 + $0x18] sm:$0xff]  ;;  %v268_v26 = vld [vmem:[%s1646_s4 + $0x10] sm:$0xff]  ;;  %v267_v27 = vld [vmem:[%s1646_s4 + $0x8] sm:$0xff]  ;;  %1192 = vmatprep.subr.mxu0 %v1280_v57 }
   0x7   :  { %1155 = vmatprep.mubr.msk.f32.mxu0 %vm132_vm0, %v64_v11  ;;  %v266_v28 = vld [vmem:[%s1646_s4] sm:$0xff]  ;;  %v345_v29 = vld [vmem:[%s1647_s6 + $0x38] sm:$0xff]  ;;  %v344_v30 = vld [vmem:[%s1647_s6 + $0x30] sm:$0xff] }
   0x8   :  { %v77_v1 = vld [vmem:[%s1660_s23 + $0x38] sm:$0xff]  ;;  %v75_v2 = vld [vmem:[%s1660_s23 + $0x28] sm:$0xff]  ;;  %v76_v8 = vld [vmem:[%s1660_s23 + $0x30] sm:$0xff] }
   0x9   :  { %115 = vperm.xlu0 %1275, %v77_v1   ;;  %105 = vperm.xlu1 %1276, %v75_v2   ;;  %v74_v12 = vld [vmem:[%s1660_s23 + $0x20] sm:$0xff]  ;;  %v73_v16 = vld [vmem:[%s1660_s23 + $0x18] sm:$0xff]  ;;  %v72_v20 = vld [vmem:[%s1660_s23 + $0x10] sm:$0xff]  ;;  %v1525_v1 = vsub.s32 0, %v120_v59 }
   0xa   :  { %1156 = vmatmul.mubr.msk.f32.gmra.mxu0 %vm132_vm0, %v65_v13  ;;  %v71_v23 = vld [vmem:[%s1660_s23 + $0x8] sm:$0xff]  ;;  %v70_v25 = vld [vmem:[%s1660_s23] sm:$0xff]  ;;  %v341_v33 = vld [vmem:[%s1647_s6 + $0x18] sm:$0xff] }
   0xb   :  { %1158 = vmatprep.mubr.msk.f32.mxu0 %vm132_vm0, %v66_v15  ;;  %v343_v31 = vld [vmem:[%s1647_s6 + $0x28] sm:$0xff]  ;;  %v342_v32 = vld [vmem:[%s1647_s6 + $0x20] sm:$0xff]  ;;  %v340_v34 = vld [vmem:[%s1647_s6 + $0x10] sm:$0xff] }
   0xc   :  { %v339_v35 = vld [vmem:[%s1647_s6 + $0x8] sm:$0xff]  ;;  %v338_v36 = vld [vmem:[%s1647_s6] sm:$0xff]  ;;  %v625_v37 = vld [vmem:[%s1648_s10 + $0x38] sm:$0xff] }
   0xd   :  { %110 = vperm.xlu0 %1275, %v76_v8   ;;  %311 = vperm.xlu1 %1276, %v273_v10   ;;  %v624_v38 = vld [vmem:[%s1648_s10 + $0x30] sm:$0xff]  ;;  %v623_v39 = vld [vmem:[%s1648_s10 + $0x28] sm:$0xff]  ;;  %v622_v40 = vld [vmem:[%s1648_s10 + $0x20] sm:$0xff] }
   0xe   :  { %1159 = vmatmul.mubr.msk.f32.gmra.mxu0 %vm132_vm0, %v67_v17  ;;  %v621_v41 = vld [vmem:[%s1648_s10 + $0x18] sm:$0xff]  ;;  %v620_v42 = vld [vmem:[%s1648_s10 + $0x10] sm:$0xff]  ;;  %v619_v43 = vld [vmem:[%s1648_s10 + $0x8] sm:$0xff] }
   0xf   :  { %1161 = vmatprep.mubr.msk.f32.mxu0 %vm132_vm0, %v68_v19  ;;  %v618_v44 = vld [vmem:[%s1648_s10] sm:$0xff]  ;;  %v826_v45 = vld [vmem:[%s1649_s12 + $0x18] sm:$0xff]  ;;  %v825_v46 = vld [vmem:[%s1649_s12 + $0x10] sm:$0xff] }
  0x10   :  { %v824_v47 = vld [vmem:[%s1649_s12 + $0x8] sm:$0xff]  ;;  %v823_v48 = vld [vmem:[%s1649_s12] sm:$0xff] }
  0x11   :  { %100 = vperm.xlu0 %1275, %v74_v12   ;;  %306 = vperm.xlu1 %1276, %v272_v14   ;;  %v525_v49 = vld [vmem:[#allocation2] sm:$0x1]  ;;  %v957_v50 = vld [vmem:[#allocation3] sm:$0x1] }
  0x12   :  { %1162 = vmatmul.mubr.msk.f32.gmra.mxu0 %vm132_vm0, %v69_v21  ;;  %v330_v51 = vld [vmem:[%s1650_s5] sm:$0xff]  ;;  %vm967_vm0 = vcmask 261120  }
  0x13   :  { %1180 = vmatprep.mubr.msk.f32.mxu1 %vm386_vm2, %v330_v51  ;;  %v59_v60 = vld [vmem:[%s1651_s1] sm:$0x1]  ;;  %v332_v51 = vld [vmem:[%s1650_s5 + $0x10] sm:$0xff]  ;;  %1208 = vmatprep.mubr.msk.f32.mxu0 %vm1281_vm3, %v1280_v57 }
  0x14   :  { %v1051_v2 = vclamps-f32 %v59_v60, 1.0 }
  0x15   :  { %95 = vperm.xlu0 %1275, %v73_v16   ;;  %301 = vperm.xlu1 %1276, %v271_v18  }
  0x16   :  { %v122_v6 = vrot.slane %v1051_v2, %v1525_v1 }
  0x19   :  { %90 = vperm.xlu0 %1275, %v72_v20   ;;  %296 = vperm.xlu1 %1276, %v270_v22  }
  0x1d   :  { %85 = vperm.xlu0 %1275, %v71_v23   ;;  %291 = vperm.xlu1 %1276, %v269_v24  }
  0x21   :  { %80 = vperm.xlu0 %1275, %v70_v25   ;;  %286 = vperm.xlu1 %1276, %v268_v26  }
  0x25   :  { %281 = vperm.xlu0 %1275, %v267_v27   ;;  %276 = vperm.xlu1 %1276, %v266_v28  }
  0x29   :  { %383 = vperm.xlu0 %1275, %v345_v29   ;;  %378 = vperm.xlu1 %1276, %v344_v30  }
  0x2d   :  { %373 = vperm.xlu0 %1275, %v343_v31   ;;  %368 = vperm.xlu1 %1276, %v342_v32  }
  0x31   :  { %363 = vperm.xlu0 %1275, %v341_v33   ;;  %358 = vperm.xlu1 %1276, %v340_v34  }
  0x35   :  { %353 = vperm.xlu0 %1275, %v339_v35   ;;  %348 = vperm.xlu1 %1276, %v338_v36  }
  0x39   :  { %663 = vperm.xlu0 %1275, %v625_v37   ;;  %658 = vperm.xlu1 %1276, %v624_v38  }
  0x3d   :  { %653 = vperm.xlu0 %1275, %v623_v39   ;;  %648 = vperm.xlu1 %1276, %v622_v40  }
  0x41   :  { %643 = vperm.xlu0 %1275, %v621_v41   ;;  %638 = vperm.xlu1 %1276, %v620_v42  }
  0x45   :  { %633 = vperm.xlu0 %1275, %v619_v43   ;;  %628 = vperm.xlu1 %1276, %v618_v44  }
  0x49   :  { %844 = vperm.xlu0 %1275, %v826_v45   ;;  %839 = vperm.xlu1 %1276, %v825_v46  }
  0x4d   :  { %834 = vperm.xlu0 %1275, %v824_v47   ;;  %829 = vperm.xlu1 %1276, %v823_v48  }
  0x51   :  { %528 = vperm.xlu0 %1275, %v525_v49   ;;  %960 = vperm.xlu1 %1276, %v957_v50   ;;  %v331_v50 = vld [vmem:[%s1650_s5 + $0x8] sm:$0xff] }
  0x84   :  { %v116_v52 = vpop.permute.xlu0 %115  ;;  %v106_v53 = vpop.permute.xlu1 %105 }
  0x85   :  { %v131_v10 = vmul.f32 %v122_v6, %v116_v52  ;;  %v129_v11 = vmul.f32 %v122_v6, %v106_v53  ;;  %v333_v52 = vld [vmem:[%s1650_s5 + $0x18] sm:$0xff]  ;;  %v334_v53 = vld [vmem:[%s1650_s5 + $0x20] sm:$0xff] }
  0x88   :  { %v111_v54 = vpop.permute.xlu0 %110  ;;  %v312_v55 = vpop.permute.xlu1 %311 }
  0x89   :  { %v130_v14 = vmul.f32 %v122_v6, %v111_v54  ;;  %v335_v54 = vld [vmem:[%s1650_s5 + $0x28] sm:$0xff] }
  0x8c   :  { %v101_v56 = vpop.permute.xlu0 %100  ;;  %v307_v58 = vpop.permute.xlu1 %306 }
  0x8d   :  { %v128_v15 = vmul.f32 %v122_v6, %v101_v56  ;;  %v337_v56 = vld [vmem:[%s1650_s5 + $0x38] sm:$0xff] }
  0x90   :  { %v96_v61 = vpop.permute.xlu0 %95  ;;  %v302_v63 = vpop.permute.xlu1 %301 }
  0x91   :  { %v127_v20 = vmul.f32 %v122_v6, %v96_v61 }
  0x94   :  { %v91_v4 = vpop.permute.xlu0 %90  ;;  %v297_v7 = vpop.permute.xlu1 %296 }
  0x95   :  { %v126_v24 = vmul.f32 %v122_v6, %v91_v4 }
  0x98   :  { %v86_v12 = vpop.permute.xlu0 %85  ;;  %v292_v18 = vpop.permute.xlu1 %291 }
  0x99   :  { %v125_v25 = vmul.f32 %v122_v6, %v86_v12 }
  0x9c   :  { %v81_v30 = vpop.permute.xlu0 %80  ;;  %v287_v34 = vpop.permute.xlu1 %286 }
  0x9d   :  { %v124_v35 = vmul.f32 %v122_v6, %v81_v30  ;;  %v612_v30 = vld [vmem:[%s1652_s9 + $0x10] sm:$0xff] }
  0xa0   :  { %v282_v42 = vpop.permute.xlu0 %281  ;;  %v277_v45 = vpop.permute.xlu1 %276 }
  0xa4   :  { %v384_v61 = vpop.permute.xlu0 %383 }
  0xc6   :  { %v1154_v62 = vpop.f32.mrf.mxu0 }
  0xc7   :  { %v233_v36 = vadd.f32 %v1154_v62, %v125_v25 }
  0xc8   :  { %v227_v0 = vpop.f32.mrf.mxu0 }
  0xc9   :  { %v228_v39 = vadd.f32 %v227_v0, %v124_v35  ;;  %v315_v43 = vadd.f32 %v282_v42, %v233_v36  ;;  %v617_v35 = vld [vmem:[%s1652_s9 + $0x38] sm:$0xff]  ;;  %v819_v36 = vld [vmem:[%s1654_s11] sm:$0xff] }
  0xca   :  { %v1157_v3 = vpop.f32.mrf.mxu0 }
  0xcb   :  { %v243_v26 = vadd.f32 %v1157_v3, %v127_v20  ;;  %v314_v46 = vadd.f32 %v277_v45, %v228_v39  ;;  %v323_v48 = vmax.f32 %v315_v43, 0.0  ;;  %v374_v3 = vpop.permute.xlu0 %373 }
  0xcc   :  { %v237_v5 = vpop.f32.mrf.mxu0 }
  0xcd   :  { %v238_v31 = vadd.f32 %v237_v5, %v126_v24  ;;  %v317_v37 = vadd.f32 %v292_v18, %v243_v26  ;;  %v322_v49 = vmax.f32 %v314_v46, 0.0 }
  0xce   :  { %v1160_v8 = vpop.f32.mrf.mxu0 }
  0xcf   :  { %v253_v16 = vadd.f32 %v1160_v8, %v129_v11  ;;  %v316_v40 = vadd.f32 %v287_v34, %v238_v31  ;;  %v325_v44 = vmax.f32 %v317_v37, 0.0  ;;  %v364_v12 = vpop.permute.xlu0 %363  ;;  %v613_v31 = vld [vmem:[%s1652_s9 + $0x18] sm:$0xff]  ;;  %v616_v34 = vld [vmem:[%s1652_s9 + $0x30] sm:$0xff] }
  0xd0   :  { %v247_v9 = vpop.f32.mrf.mxu0 }
  0xd1   :  { %v248_v21 = vadd.f32 %v247_v9, %v128_v15  ;;  %v319_v27 = vadd.f32 %v302_v63, %v253_v16  ;;  %v324_v47 = vmax.f32 %v316_v40, 0.0  ;;  %v379_v63 = vpop.permute.xlu1 %378 }
  0xd2   :  { %v1163_v13 = vpop.f32.mrf.mxu0 }
  0xd3   :  { %v263_v17 = vadd.f32 %v1163_v13, %v131_v10  ;;  %v318_v32 = vadd.f32 %v297_v7, %v248_v21  ;;  %v327_v38 = vmax.f32 %v319_v27, 0.0  ;;  %v354_v20 = vpop.permute.xlu0 %353 }
  0xd4   :  { %v257_v19 = vpop.f32.mrf.mxu0 }
  0xd5   :  { %v258_v22 = vadd.f32 %v257_v19, %v130_v14  ;;  %v321_v23 = vadd.f32 %v312_v55, %v263_v17  ;;  %v326_v41 = vmax.f32 %v318_v32, 0.0  ;;  %v336_v55 = vld [vmem:[%s1650_s5 + $0x30] sm:$0xff]  ;;  %v369_v5 = vpop.permute.xlu1 %368  ;;  %v614_v32 = vld [vmem:[%s1652_s9 + $0x20] sm:$0xff] }
  0xd7   :  { %v320_v28 = vadd.f32 %v307_v58, %v258_v22  ;;  %v329_v29 = vmax.f32 %v321_v23, 0.0  ;;  %v610_v58 = vld [vmem:[%s1652_s9] sm:$0xff]  ;;  %v664_v37 = vpop.permute.xlu0 %663 }
  0xd9   :  { %v328_v33 = vmax.f32 %v320_v28, 0.0  ;;  %1164 = vmatprep.subr.mxu1 %v329_v29  ;;  %v359_v15 = vpop.permute.xlu1 %358  ;;  %v524_v28 = vld [vmem:[%s1653_s7] sm:$0x1] }
  0xda   :  { %1165 = vmatpush3.msra.mxu1 %v329_v29  ;;  %v611_v29 = vld [vmem:[%s1652_s9 + $0x8] sm:$0xff] }
  0xdb   :  { %1166 = vmatprep.subr.mxu1 %v328_v33 }
  0xdc   :  { %1167 = vmatpush3.msra.mxu1 %v328_v33  ;;  %v615_v33 = vld [vmem:[%s1652_s9 + $0x28] sm:$0xff] }
  0xdd   :  { %1168 = vmatprep.subr.mxu1 %v327_v38  ;;  %v349_v23 = vpop.permute.xlu1 %348 }
  0xde   :  { %1169 = vmatpush3.msra.mxu1 %v327_v38  ;;  %v654_v38 = vpop.permute.xlu0 %653 }
  0xdf   :  { %1170 = vmatprep.subr.mxu1 %v326_v41 }
  0xe0   :  { %1171 = vmatpush3.msra.mxu1 %v326_v41 }
  0xe1   :  { %1172 = vmatprep.subr.mxu1 %v325_v44 }
  0xe2   :  { %1173 = vmatpush3.msra.mxu1 %v325_v44  ;;  %v644_v39 = vpop.permute.xlu0 %643 }
  0xe3   :  { %1174 = vmatprep.subr.mxu1 %v324_v47 }
  0xe4   :  { %1175 = vmatpush3.msra.mxu1 %v324_v47 }
  0xe5   :  { %1176 = vmatprep.subr.mxu1 %v323_v48 }
  0xe6   :  { %1177 = vmatpush3.msra.mxu1 %v323_v48  ;;  %v634_v40 = vpop.permute.xlu0 %633 }
  0xe7   :  { %1178 = vmatprep.subr.mxu1 %v322_v49 }
  0xe8   :  { %1179 = vmatpush3.msra.mxu1 %v322_v49 }
  0xe9   :  { %1181 = vmatmul.mubr.msk.f32.vlgmr.msra.gmra.mxu1 %vm386_vm2, %v331_v50  ;;  %v659_v50 = vpop.permute.xlu1 %658 }
  0xea   :  { %1183 = vmatprep.mubr.msk.f32.mxu1 %vm386_vm2, %v332_v51  ;;  %v1606_v41 = vpop.permute.xlu0 %844 }
  0xed   :  { %1184 = vmatmul.mubr.msk.f32.gmra.mxu1 %vm386_vm2, %v333_v52 }
  0xee   :  { %1186 = vmatprep.mubr.msk.f32.mxu1 %vm386_vm2, %v334_v53  ;;  %v1608_v42 = vpop.permute.xlu0 %834 }
  0xf1   :  { %1187 = vmatmul.mubr.msk.f32.gmra.mxu1 %vm386_vm2, %v335_v54  ;;  %v649_v54 = vpop.permute.xlu1 %648 }
  0xf2   :  { %1189 = vmatprep.mubr.msk.f32.mxu1 %vm386_vm2, %v336_v55  ;;  %v529_v43 = vpop.permute.xlu0 %528 }
  0xf3   :  { %v534_v44 = vrot.slane %v529_v43, %v1525_v1 }
  0xf5   :  { %1190 = vmatmul.mubr.msk.f32.gmra.mxu1 %vm386_vm2, %v337_v56 }
  0xf6   :  { %1227 = vmatprep.mubr.msk.f32.mxu1 %vm386_vm2, %v610_v58 }
 0x1a9   :  { %v1182_v59 = vpop.f32.mrf.mxu1 }
 0x1aa   :  { %v483_v21 = vadd.f32 %v1182_v59, %v354_v20 }
 0x1ab   :  { %v477_v60 = vpop.f32.mrf.mxu1 }
 0x1ac   :  { %v478_v24 = vadd.f32 %v477_v60, %v349_v23  ;;  %v517_v26 = vmax.f32 %v483_v21, 0.0  ;;  %v820_v23 = vld [vmem:[%s1654_s11 + $0x8] sm:$0xff] }
 0x1ad   :  { %v1185_v62 = vpop.f32.mrf.mxu1 }
 0x1ae   :  { %v493_v16 = vadd.f32 %v1185_v62, %v364_v12  ;;  %v516_v27 = vmax.f32 %v478_v24, 0.0  ;;  %v821_v24 = vld [vmem:[%s1654_s11 + $0x10] sm:$0xff] }
 0x1af   :  { %v487_v0 = vpop.f32.mrf.mxu1 }
 0x1b0   :  { %v488_v18 = vadd.f32 %v487_v0, %v359_v15  ;;  %v519_v22 = vmax.f32 %v493_v16, 0.0 }
 0x1b1   :  { %v1188_v2 = vpop.f32.mrf.mxu1 }
 0x1b2   :  { %v503_v9 = vadd.f32 %v1188_v2, %v374_v3  ;;  %v518_v25 = vmax.f32 %v488_v18, 0.0  ;;  %v639_v2 = vpop.permute.xlu1 %638 }
 0x1b3   :  { %v497_v4 = vpop.f32.mrf.mxu1 }
 0x1b4   :  { %v498_v13 = vadd.f32 %v497_v4, %v369_v5  ;;  %v521_v17 = vmax.f32 %v503_v9, 0.0 }
 0x1b5   :  { %v1191_v6 = vpop.f32.mrf.mxu1 }
 0x1b6   :  { %v513_v7 = vadd.f32 %v1191_v6, %v384_v61  ;;  %v520_v19 = vmax.f32 %v498_v13, 0.0  ;;  %v629_v13 = vpop.permute.xlu1 %628 }
 0x1b7   :  { %v507_v8 = vpop.f32.mrf.mxu1 }
 0x1b8   :  { %v523_v10 = vmax.f32 %v513_v7, 0.0  ;;  %v508_v11 = vadd.f32 %v507_v8, %v379_v63 }
 0x1ba   :  { %v522_v14 = vmax.f32 %v508_v11, 0.0  ;;  %1193 = vmatpush3.msra.mxu0 %v523_v10  ;;  %1211 = vmatprep.subr.mxu1 %v523_v10 }
 0x1bb   :  { %1194 = vmatprep.subr.mxu0 %v1280_v57  ;;  %1212 = vmatpush3.msra.mxu1 %v523_v10 }
 0x1bc   :  { %1195 = vmatpush3.msra.mxu0 %v522_v14  ;;  %1213 = vmatprep.subr.mxu1 %v522_v14 }
 0x1bd   :  { %1196 = vmatprep.subr.mxu0 %v1280_v57  ;;  %1214 = vmatpush3.msra.mxu1 %v522_v14 }
 0x1be   :  { %1197 = vmatpush3.msra.mxu0 %v521_v17  ;;  %1215 = vmatprep.subr.mxu1 %v521_v17 }
 0x1bf   :  { %1198 = vmatprep.subr.mxu0 %v1280_v57  ;;  %1216 = vmatpush3.msra.mxu1 %v521_v17 }
 0x1c0   :  { %1199 = vmatpush3.msra.mxu0 %v520_v19  ;;  %1217 = vmatprep.subr.mxu1 %v520_v19 }
 0x1c1   :  { %1200 = vmatprep.subr.mxu0 %v1280_v57  ;;  %1218 = vmatpush3.msra.mxu1 %v520_v19 }
 0x1c2   :  { %1201 = vmatpush3.msra.mxu0 %v519_v22  ;;  %1219 = vmatprep.subr.mxu1 %v519_v22 }
 0x1c3   :  { %1202 = vmatprep.subr.mxu0 %v1280_v57  ;;  %1220 = vmatpush3.msra.mxu1 %v519_v22 }
 0x1c4   :  { %1203 = vmatpush3.msra.mxu0 %v518_v25  ;;  %1221 = vmatprep.subr.mxu1 %v518_v25 }
 0x1c5   :  { %1204 = vmatprep.subr.mxu0 %v1280_v57  ;;  %1222 = vmatpush3.msra.mxu1 %v518_v25  ;;  %v822_v25 = vld [vmem:[%s1654_s11 + $0x18] sm:$0xff] }
 0x1c6   :  { %1205 = vmatpush3.msra.mxu0 %v517_v26  ;;  %1223 = vmatprep.subr.mxu1 %v517_v26 }
 0x1c7   :  { %1206 = vmatprep.subr.mxu0 %v1280_v57  ;;  %1224 = vmatpush3.msra.mxu1 %v517_v26  ;;  %v840_v26 = vpop.permute.xlu1 %839 }
 0x1c8   :  { %1207 = vmatpush3.msra.mxu0 %v516_v27  ;;  %1225 = vmatprep.subr.mxu1 %v516_v27 }
 0x1c9   :  { %1209 = vmatmul.mubr.msk.f32.vlgmr.msra.gmra.mxu0 %vm386_vm2, %v524_v28  ;;  %1226 = vmatpush3.msra.mxu1 %v516_v27 }
 0x1ca   :  { %1228 = vmatmul.mubr.msk.f32.vlgmr.msra.gmra.mxu1 %vm386_vm2, %v611_v29  ;;  %1255 = vmatprep.mubr.msk.f32.mxu0 %vm386_vm2, %v819_v36 }
 0x1cb   :  { %1230 = vmatprep.mubr.msk.f32.mxu1 %vm386_vm2, %v612_v30 }
 0x1ce   :  { %1231 = vmatmul.mubr.msk.f32.gmra.mxu1 %vm386_vm2, %v613_v31 }
 0x1cf   :  { %1233 = vmatprep.mubr.msk.f32.mxu1 %vm386_vm2, %v614_v32  ;;  %v830_v32 = vpop.permute.xlu1 %829 }
 0x1d2   :  { %1234 = vmatmul.mubr.msk.f32.gmra.mxu1 %vm386_vm2, %v615_v33 }
 0x1d3   :  { %1236 = vmatprep.mubr.msk.f32.mxu1 %vm386_vm2, %v616_v34 }
 0x1d6   :  { %1237 = vmatmul.mubr.msk.f32.gmra.mxu1 %vm386_vm2, %v617_v35 }
 0x289   :  { %v604_v45 = vpop.f32.mrf.mxu0 }
 0x28a   :  { %v605_v46 = vadd.f32 %v604_v45, %v534_v44  ;;  %v1229_v47 = vpop.f32.mrf.mxu1  ;;  %v961_v45 = vpop.permute.xlu1 %960 }
 0x28b   :  { %v1210_v48 = vpop.f32.mrf.mxu0  ;;  %v762_v10 = vadd.f32 %v1229_v47, %v634_v40 }
 0x28c   :  { %1277 = vtanh.f32 %v605_v46  ;;  %v756_v49 = vpop.f32.mrf.mxu1  ;;  %v966_v46 = vrot.slane %v961_v45, %v1525_v1 }
 0x28d   :  { %v757_v14 = vadd.f32 %v756_v49, %v629_v13  ;;  %v804_v17 = vmul.f32 0.01, %v762_v10  ;;  %vm796_vm10 = vcmp.gt.f32.partialorder %v762_v10, 0.0 }
 0x28e   :  { %v1232_v51 = vpop.f32.mrf.mxu1 }
 0x28f   :  { %v772_v3 = vadd.f32 %v1232_v51, %v644_v39  ;;  %v803_v19 = vmul.f32 0.01, %v757_v14  ;;  %vm795_vm11 = vcmp.gt.f32.partialorder %v757_v14, 0.0  ;;  %v812_v21 = vsel %vm796_vm10, %v762_v10, %v804_v17 }
 0x290   :  { %v766_v52 = vpop.f32.mrf.mxu1 }
 0x291   :  { %v767_v7 = vadd.f32 %v766_v52, %v639_v2  ;;  %v806_v11 = vmul.f32 0.01, %v772_v3  ;;  %vm798_vm8 = vcmp.gt.f32.partialorder %v772_v3, 0.0  ;;  %v811_v22 = vsel %vm795_vm11, %v757_v14, %v803_v19 }
 0x292   :  { %v1235_v53 = vpop.f32.mrf.mxu1 }
 0x293   :  { %v782_v58 = vadd.f32 %v1235_v53, %v654_v38  ;;  %v805_v15 = vmul.f32 0.01, %v767_v7  ;;  %vm797_vm9 = vcmp.gt.f32.partialorder %v767_v7, 0.0  ;;  %v814_v18 = vsel %vm798_vm8, %v772_v3, %v806_v11 }
 0x294   :  { %v776_v55 = vpop.f32.mrf.mxu1 }
 0x295   :  { %v777_v62 = vadd.f32 %v776_v55, %v649_v54  ;;  %v808_v4 = vmul.f32 0.01, %v782_v58  ;;  %vm800_vm6 = vcmp.gt.f32.partialorder %v782_v58, 0.0  ;;  %v813_v20 = vsel %vm797_vm9, %v767_v7, %v805_v15 }
 0x296   :  { %v1238_v56 = vpop.f32.mrf.mxu1 }
 0x297   :  { %v792_v59 = vadd.f32 %v1238_v56, %v664_v37  ;;  %v807_v8 = vmul.f32 0.01, %v777_v62  ;;  %vm799_vm7 = vcmp.gt.f32.partialorder %v777_v62, 0.0  ;;  %v816_v12 = vsel %vm800_vm6, %v782_v58, %v808_v4 }
 0x298   :  { %v786_v60 = vpop.f32.mrf.mxu1 }
 0x299   :  { %v1278_v61 = vpop.eup %1277  ;;  %v810_v63 = vmul.f32 0.01, %v792_v59  ;;  %v787_v0 = vadd.f32 %v786_v60, %v659_v50  ;;  %vm802_vm4 = vcmp.gt.f32.partialorder %v792_v59, 0.0  ;;  %v815_v16 = vsel %vm799_vm7, %v777_v62, %v807_v8 }
 0x29a   :  { %609 = vst [vmem:[%s1655_s15] sm:$0x1] %v1278_v61 }
 0x29b   :  { %v809_v5 = vmul.f32 0.01, %v787_v0  ;;  %v818_v6 = vsel %vm802_vm4, %v792_v59, %v810_v63  ;;  %vm801_vm5 = vcmp.gt.f32.partialorder %v787_v0, 0.0 }
 0x29c   :  { %1239 = vmatprep.subr.mxu0 %v818_v6 }
 0x29d   :  { %1240 = vmatpush3.msra.mxu0 %v818_v6  ;;  %v817_v9 = vsel %vm801_vm5, %v787_v0, %v809_v5 }
 0x29e   :  { %1241 = vmatprep.subr.mxu0 %v817_v9 }
 0x29f   :  { %1242 = vmatpush3.msra.mxu0 %v817_v9 }
 0x2a0   :  { %1243 = vmatprep.subr.mxu0 %v816_v12 }
 0x2a1   :  { %1244 = vmatpush3.msra.mxu0 %v816_v12 }
 0x2a2   :  { %1245 = vmatprep.subr.mxu0 %v815_v16 }
 0x2a3   :  { %1246 = vmatpush3.msra.mxu0 %v815_v16 }
 0x2a4   :  { %1247 = vmatprep.subr.mxu0 %v814_v18 }
 0x2a5   :  { %1248 = vmatpush3.msra.mxu0 %v814_v18 }
 0x2a6   :  { %1249 = vmatprep.subr.mxu0 %v813_v20 }
 0x2a7   :  { %1250 = vmatpush3.msra.mxu0 %v813_v20 }
 0x2a8   :  { %1251 = vmatprep.subr.mxu0 %v812_v21 }
 0x2a9   :  { %1252 = vmatpush3.msra.mxu0 %v812_v21 }
 0x2aa   :  { %1253 = vmatprep.subr.mxu0 %v811_v22 }
 0x2ab   :  { %1254 = vmatpush3.msra.mxu0 %v811_v22 }
 0x2ac   :  { %1256 = vmatmul.mubr.msk.f32.vlgmr.msra.gmra.mxu0 %vm386_vm2, %v820_v23  ;;  %1261 = vmatprep.subr.mxu0 %v1280_v57 }
 0x2ad   :  { %1258 = vmatprep.mubr.msk.f32.mxu0 %vm386_vm2, %v821_v24 }
 0x2b0   :  { %1259 = vmatmul.mubr.msk.f32.gmra.mxu0 %vm386_vm2, %v822_v25 }
 0x2b1   :  { %1269 = vmatprep.mubr.msk.f32.mxu0 %vm1281_vm3, %v1280_v57 }
 0x36c   :  { %v1257_v27 = vpop.f32.mrf.mxu0 }
 0x36d   :  { %v931_v30 = vadd.f32 %v1257_v27, %v1608_v42  ;;  %v956_v42 = vld [vmem:[%s1656_s13] sm:$0x1] }
 0x36e   :  { %v925_v28 = vpop.f32.mrf.mxu0 }
 0x36f   :  { %v926_v34 = vadd.f32 %v925_v28, %v830_v32  ;;  %v949_v37 = vmul.f32 0.01, %v931_v30  ;;  %vm945_vm14 = vcmp.gt.f32.partialorder %v931_v30, 0.0 }
 0x370   :  { %v1260_v29 = vpop.f32.mrf.mxu0 }
 0x371   :  { %v941_v31 = vadd.f32 %v1260_v29, %v1606_v41  ;;  %v948_v40 = vmul.f32 0.01, %v926_v34  ;;  %vm944_vm15 = vcmp.gt.f32.partialorder %v926_v34, 0.0  ;;  %v953_v41 = vsel %vm945_vm14, %v931_v30, %v949_v37 }
 0x372   :  { %v935_v33 = vpop.f32.mrf.mxu0 }
 0x373   :  { %vm947_vm12 = vcmp.gt.f32.partialorder %v941_v31, 0.0  ;;  %v951_v35 = vmul.f32 0.01, %v941_v31  ;;  %v936_v36 = vadd.f32 %v935_v33, %v840_v26  ;;  %v952_v44 = vsel %vm944_vm15, %v926_v34, %v948_v40 }
 0x375   :  { %vm946_vm13 = vcmp.gt.f32.partialorder %v936_v36, 0.0  ;;  %v950_v38 = vmul.f32 0.01, %v936_v36  ;;  %v955_v39 = vsel %vm947_vm12, %v941_v31, %v951_v35 }
 0x376   :  { %1262 = vmatpush3.msra.mxu0 %v955_v39 }
 0x377   :  { %1263 = vmatprep.subr.mxu0 %v1280_v57  ;;  %v954_v43 = vsel %vm946_vm13, %v936_v36, %v950_v38 }
 0x378   :  { %1264 = vmatpush3.msra.mxu0 %v954_v43 }
 0x379   :  { %1265 = vmatprep.subr.mxu0 %v1280_v57 }
 0x37a   :  { %1266 = vmatpush3.msra.mxu0 %v953_v41 }
 0x37b   :  { %1267 = vmatprep.subr.mxu0 %v1280_v57 }
 0x37c   :  { %1268 = vmatpush3.msra.mxu0 %v952_v44 }
 0x37d   :  { %1270 = vmatmul.mubr.msk.f32.vlgmr.msra.gmra.mxu0 %vm967_vm0, %v956_v42 }
 0x43d   :  { %v1037_v47 = vpop.f32.mrf.mxu0 }
 0x43e   :  { %v1038_v48 = vadd.f32 %v1037_v47, %v966_v46 }
 0x43f   :  { %v1271_v49 = vpop.f32.mrf.mxu0 }
 0x440   :  { %1041 = vst [vmem:[%s1657_s16] sm:$0x1] %v1038_v48 }

</bundles_post_ra>
